<compile_context>
chip_gen: v7x
topology: tpu7x:2x2x1
jax: 0.10.0
libtpu: 0.0.40
codegen_flags: <defaults>
</compile_context>

<pallas_src>
import jax
import jax.numpy as jnp
from jax.experimental import pallas as pl
from jax.experimental.pallas import tpu as pltpu


def _sigmoid_mul_conv1x1_kernel(gate_ref, w_ref, x_ref, o_ref):
    # gate_ref: (1, Cin)    pre-sigmoid SE logits (resident across grid steps)
    # w_ref:    (tco, Cin)  slice of the 1x1 conv weight for this grid step
    # x_ref:    (Cin, M)    feature map, native NCHW flattening (resident)
    # o_ref:    (tco, M)    output slice
    gate = jax.nn.sigmoid(gate_ref[...].astype(jnp.float32))              # (1, Cin)  EUP
    # Fold the channel gate into the small weight slice, then feed the MXU bf16
    # operands with f32 accumulation (single bf16 pass instead of ~3 f32 passes).
    wg = (w_ref[...].astype(jnp.float32) * gate).astype(jnp.bfloat16)     # (tco, Cin) VPU
    xb = x_ref[...].astype(jnp.bfloat16)                                  # (Cin, M)
    o_ref[...] = jnp.dot(
        wg, xb, preferred_element_type=jnp.float32
    ).astype(o_ref.dtype)


def sigmoid_mul_conv2d(x301, x297, weight):
    """x301: (1, Cin, 1, 1), x297: (1, Cin, H, W), weight: (Cout, Cin, 1, 1)
    -> (1, Cout, H, W), equivalent to conv2d_1x1(sigmoid(x301) * x297, weight)."""
    N, Cin, H, W = x297.shape
    Cout = weight.shape[0]
    assert N == 1, "kernel assumes batch 1 (as in the reference module)"

    M = H * W
    # All reshapes below are zero-copy layout reinterpretations.
    x2d = x297.reshape(Cin, M)          # (Cin, M)
    g2d = x301.reshape(1, Cin)          # (1, Cin)
    w2d = weight.reshape(Cout, Cin)     # (Cout, Cin) -- no transpose

    # Split Cout into 2 sublane-aligned blocks when possible (v7x: one per TC).
    if Cout % 16 == 0 and Cout >= 16:
        tco = Cout // 2
    else:
        tco = Cout
    n_co = Cout // tco

    flops = 2 * Cout * Cin * M + Cout * Cin
    bytes_accessed = 4 * (Cin * M + Cout * Cin + Cin + Cout * M)

    out2d = pl.pallas_call(
        _sigmoid_mul_conv1x1_kernel,
        out_shape=jax.ShapeDtypeStruct((Cout, M), x297.dtype),
        grid=(n_co,),
        in_specs=[
            pl.BlockSpec((1, Cin), lambda co: (0, 0)),        # gate: fetched once
            pl.BlockSpec((tco, Cin), lambda co: (co, 0)),     # weight slice per step
            pl.BlockSpec((Cin, M), lambda co: (0, 0)),        # x: fetched once
        ],
        out_specs=pl.BlockSpec((tco, M), lambda co: (co, 0)),
        compiler_params=pltpu.CompilerParams(
            dimension_semantics=("parallel",),
        ),
        cost_estimate=pl.CostEstimate(
            flops=flops, transcendentals=Cin * n_co, bytes_accessed=bytes_accessed
        ),
    )(g2d, w2d, x2d)

    # (Cout, M) -> (1, Cout, H, W): zero-copy reshape, no transpose needed.
    return out2d.reshape(N, Cout, H, W)


if __name__ == "__main__":
    key = jax.random.PRNGKey(0)
    k1, k2, k3 = jax.random.split(key, 3)

    N, Cin, Cout, Hs, Ws = 1, 960, 160, 14, 14

    x297 = jax.random.normal(k1, (N, Cin, Hs, Ws), dtype=jnp.float32)   # feature map
    x301 = jax.random.normal(k2, (N, Cin, 1, 1), dtype=jnp.float32)     # SE gate logits
    bound = 1.0 / (Cin ** 0.5)                                          # 1x1 conv init bound
    weight = jax.random.uniform(k3, (Cout, Cin, 1, 1), dtype=jnp.float32,
                                minval=-bound, maxval=bound)

    out = sigmoid_mul_conv2d(x301, x297, weight)
    out = jax.block_until_ready(out)
    assert out.shape == (N, Cout, Hs, Ws)

    # Tight check against a reference that applies the same bf16 input quantization
    # (the kernel accumulates in f32, so only input rounding differs).
    gate = jax.nn.sigmoid(x301.reshape(1, Cin).astype(jnp.float32))
    wg_q = (weight.reshape(Cout, Cin) * gate).astype(jnp.bfloat16).astype(jnp.float32)
    x_q = x297.reshape(Cin, Hs * Ws).astype(jnp.bfloat16).astype(jnp.float32)
    ref_q = (wg_q @ x_q).reshape(N, Cout, Hs, Ws)
    assert jnp.allclose(out, ref_q, atol=5e-3, rtol=5e-3), "mismatch vs bf16-quantized ref"

    # Loose check against the exact f32 reference (error budget = bf16 operand rounding
    # only; accumulation over Cin=960 stays in f32 on the MXU).
    gated = jax.nn.sigmoid(x301) * x297
    ref = jnp.einsum("nchw,oc->nohw", gated, weight.reshape(Cout, Cin))
    assert jnp.max(jnp.abs(out - ref)) < 5e-2, "mismatch vs full-precision ref"

    print("KERNEL_OK")
</pallas_src>

<mosaic_0001>
module attributes {stable_mosaic.version = 11 : i64} {
  func.func @_sigmoid_mul_conv1x1_kernel(%arg0: i32, %arg1: memref<1x960xf32, #tpu.memory_space<vmem>>, %arg2: memref<80x960xf32, #tpu.memory_space<vmem>>, %arg3: memref<960x196xf32, #tpu.memory_space<vmem>>, %arg4: memref<80x196xf32, #tpu.memory_space<vmem>>) attributes {dimension_semantics = [#tpu.dimension_semantics<parallel>], iteration_bounds = array<i64: 2>, scalar_prefetch = 0 : i64, scratch_operands = 0 : i64, tpu.core_type = #tpu.core_type<tc>, window_params = [{pipeline_mode = #tpu.pipeline_mode<synchronous>, transform_indices = @transform_0, window_bounds = array<i64: 1, 960>}, {transform_indices = @transform_1, window_bounds = array<i64: 80, 960>}, {pipeline_mode = #tpu.pipeline_mode<synchronous>, transform_indices = @transform_2, window_bounds = array<i64: 960, 196>}, {transform_indices = @transform_3, window_bounds = array<i64: 80, 196>}]} {
    %c0 = arith.constant 0 : index
    %c0_0 = arith.constant 0 : index
    %0 = vector.load %arg1[%c0, %c0_0] : memref<1x960xf32, #tpu.memory_space<vmem>>, vector<1x960xf32>
    %1 = arith.negf %0 : vector<1x960xf32>
    %2 = math.exp %1 : vector<1x960xf32>
    %cst = arith.constant 1.000000e+00 : f32
    %3 = vector.broadcast %cst : f32 to vector<1x960xf32>
    %4 = arith.addf %3, %2 : vector<1x960xf32>
    %5 = arith.divf %3, %4 : vector<1x960xf32>
    %c0_1 = arith.constant 0 : index
    %c0_2 = arith.constant 0 : index
    %6 = vector.load %arg2[%c0_1, %c0_2] : memref<80x960xf32, #tpu.memory_space<vmem>>, vector<80x960xf32>
    %7 = vector.broadcast %5 : vector<1x960xf32> to vector<80x960xf32>
    %8 = arith.mulf %6, %7 : vector<80x960xf32>
    %9 = arith.truncf %8 : vector<80x960xf32> to vector<80x960xbf16>
    %c0_3 = arith.constant 0 : index
    %c0_4 = arith.constant 0 : index
    %10 = vector.load %arg3[%c0_3, %c0_4] : memref<960x196xf32, #tpu.memory_space<vmem>>, vector<960x196xf32>
    %11 = arith.truncf %10 : vector<960x196xf32> to vector<960x196xbf16>
    %cst_5 = arith.constant dense<0.000000e+00> : vector<80x196xf32>
    %12 = tpu.matmul %9, %11, %cst_5 {dimension_numbers = #tpu.dot_dimension_numbers<[1], [0], [0], [1], [0, 0, 1, 1], [], []>} : vector<80x960xbf16>, vector<960x196xbf16>, vector<80x196xf32> -> vector<80x196xf32>
    %c0_6 = arith.constant 0 : index
    %c0_7 = arith.constant 0 : index
    %13 = vector.load %arg4[%c0_6, %c0_7] : memref<80x196xf32, #tpu.memory_space<vmem>>, vector<80x196xf32>
    tpu.vector_store %arg4[%c0_6, %c0_7], %12 {strides = array<i32>} : memref<80x196xf32, #tpu.memory_space<vmem>>, vector<80x196xf32>,
    return
  }
  func.func @transform_0(%arg0: i32) -> (i32, i32) {
    %c0_i32 = arith.constant 0 : i32
    %c0_i32_0 = arith.constant 0 : i32
    %c0_i32_1 = arith.constant 0 : i32
    return %c0_i32, %c0_i32_0 : i32, i32
  }
  func.func @transform_1(%arg0: i32) -> (i32, i32) {
    %c0_i32 = arith.constant 0 : i32
    %c0_i32_0 = arith.constant 0 : i32
    return %arg0, %c0_i32 : i32, i32
  }
  func.func @transform_2(%arg0: i32) -> (i32, i32) {
    %c0_i32 = arith.constant 0 : i32
    %c0_i32_0 = arith.constant 0 : i32
    %c0_i32_1 = arith.constant 0 : i32
    return %c0_i32, %c0_i32_0 : i32, i32
  }
  func.func @transform_3(%arg0: i32) -> (i32, i32) {
    %c0_i32 = arith.constant 0 : i32
    %c0_i32_0 = arith.constant 0 : i32
    return %arg0, %c0_i32 : i32, i32
  }
}

</mosaic_0001>

<bundles_post_ra>
// kernel: tpu_custom_call.1
= control target key start
LH: loop header
LB: loop body
LE: loop exit
PB: predicated region body
PF: predicated region fallthrough
CT: control target
= control target key end

     0   :  { %8 = vsyncpa [#allocation3], 0  ;;  %s2659_s0 = inlined_call_operand.vmem [shape: f32[1,960], index: 0, kind: input, shape index: {}]   ;;  %s2660_s1 = inlined_call_operand.vmem [shape: f32[160,960], index: 1, kind: input, shape index: {}]   ;;  %s2661_s2 = inlined_call_operand.vmem [shape: f32[960,196], index: 2, kind: input, shape index: {}]   ;;  %s2662_s3 = inlined_call_operand.hbm [shape: f32[160,196], index: 3, kind: output, shape index: {}]  }
   0x1   :  { %10 = vsyncpa [#allocation3 + $0x1], 0  ;;  %s1443_s12 = smov 0   ;;  %s1445_s13 = smov 0  }
   0x2   :  { %s1447_s14 = smov 0   ;;  %s1449_s15 = smov 0  }
   0x3 LB: > { %s1464_s16 = sadd.s32 4294967295, %s1418_s15   ;;  %s1230_s17 = sadd.s32 4294967294, %s1418_s15   ;;  %s1418_s15 = sphi %s1449_s15, %s2669_s15   ;;  %s1414_s14 = sphi %s1447_s14, %s2668_s14   ;;  %s1410_s13 = sphi %s1445_s13, %s2667_s13   ;;  %s1406_s12 = sphi %s1443_s12, %s2666_s12  }
   0x4   : > { %s1468_s18 = sadd.s32 1, %s1418_s15   ;;  %s91_s19 = sadd.s32 1, %s1414_s14 }
   0x5   : > { %s88_s20 = ssub.s32 %s1418_s15, %s1468_s18  ;;  %p101_p0 = scmp.ne.s32.totalorder %s1414_s14, %s1410_s13 }
   0x6   : > { %p89_p1 = scmp.eq.s32.totalorder %s88_s20, 0  ;;  %p102_p2 = scmp.eq.s32.totalorder %s1464_s16, 1 }
   0x7   : > { %p107_p3 = scmp.ne.s32.totalorder %s1410_s13, %s1406_s12  ;;  %p108_p4 = scmp.eq.s32.totalorder %s1230_s17, 1 }
   0x8   : > { %s1479_s21 = scalar_select %p89_p1, %s1414_s14, %s91_s19  }
   0x9   : > { %p1481_p5 = por %p102_p2, %p101_p0  ;;  %p1485_p6 = por %p108_p4, %p107_p3 }
   0xa   : > { %p1233_p7 = scmp.ge.s32.totalorder %s1418_s15, 1  ;;  %p142_p8 = scmp.lt.s32.totalorder %s1418_s15, 3 }
   0xc   : > { %p143_p9 = pnand %p1233_p7, %p142_p8 }
   0xd   : > { %v425_v0 = vld [vmem:[%s2661_s2 + $0x8] sm:$0xff] (!%p143_p9)  ;;  %v427_v1 = vld [vmem:[%s2661_s2 + $0x18] sm:$0xff] (!%p143_p9)  ;;  %v424_v5 = vld [vmem:[%s2661_s2] sm:$0xff] (!%p143_p9)  ;;  %s167_s26 = smul.u32 (!%p143_p9), 10, %s1464_s16  ;;  %vm784_vm0 = vcmask (!%p143_p9), 523264   ;;  %vm1133_vm1 = vcmask (!%p143_p9), 556032  }
   0xe   : > { %146 = sbr.rel (%p143_p9) target bundleno = 408 (0x198), region = 32  ;;  %v553_v2 = vld [vmem:[%s2661_s2 + $0x408] sm:$0xff] (!%p143_p9)  ;;  %v665_v3 = vpack.c.bf16 (!%p143_p9), %v427_v1, %v425_v0  ;;  %v555_v4 = vld [vmem:[%s2661_s2 + $0x418] sm:$0xff] (!%p143_p9)  ;;  %v426_v6 = vld [vmem:[%s2661_s2 + $0x10] sm:$0xff] (!%p143_p9)  ;;  %s1420_s5 = smov (!%p143_p9), [#allocation2]  }
   0xf   : > { %v729_v7 = vpack.c.bf16 (!%p143_p9), %v555_v4, %v553_v2  ;;  %v664_v8 = vpack.c.bf16 (!%p143_p9), %v426_v6, %v424_v5  ;;  %v552_v9 = vld [vmem:[%s2661_s2 + $0x400] sm:$0xff] (!%p143_p9)  ;;  %v554_v10 = vld [vmem:[%s2661_s2 + $0x410] sm:$0xff] (!%p143_p9)  ;;  %v429_v11 = vld [vmem:[%s2661_s2 + $0x28] sm:$0xff] (!%p143_p9)  ;;  %p1845_p10 = scmp.lt.s32.totalorder (!%p143_p9), %s167_s26, 19  ;;  %s1360_s25 = sshll.u32 (!%p143_p9), %s1420_s5, 4  ;;  %s1361_s25 = int_to_ptr.vmem [resolvable:$false] %s1360_s25 }
  0x10   : > { %800 = vmatprep.subr.bf16.mxu1 (!%p143_p9), %v665_v3  ;;  %v728_v12 = vpack.c.bf16 (!%p143_p9), %v554_v10, %v552_v9  ;;  %v431_v13 = vld [vmem:[%s2661_s2 + $0x38] sm:$0xff] (!%p143_p9)  ;;  %v557_v14 = vld [vmem:[%s2661_s2 + $0x428] sm:$0xff] (!%p143_p9)  ;;  %v428_v18 = vld [vmem:[%s2661_s2 + $0x20] sm:$0xff] (!%p143_p9)  ;;  %s1362_s6 = scalar_lea.vmem (!%p143_p9), %s1361_s25, 5120 }
  0x11   : > { %v559_v15 = vld [vmem:[%s2661_s2 + $0x438] sm:$0xff] (!%p143_p9)  ;;  %966 = vmatprep.subr.bf16.mxu0 (!%p143_p9), %v729_v7  ;;  %801 = vmatpush1.bf16.msra.mxu1 (!%p143_p9), %v664_v8  ;;  %v667_v16 = vpack.c.bf16 (!%p143_p9), %v431_v13, %v429_v11  ;;  %v430_v19 = vld [vmem:[%s2661_s2 + $0x30] sm:$0xff] (!%p143_p9)  ;;  %v556_v20 = vld [vmem:[%s2661_s2 + $0x420] sm:$0xff] (!%p143_p9) }
  0x12   : > { %v731_v17 = vpack.c.bf16 (!%p143_p9), %v559_v15, %v557_v14  ;;  %967 = vmatpush1.bf16.msra.mxu0 (!%p143_p9), %v728_v12  ;;  %v666_v21 = vpack.c.bf16 (!%p143_p9), %v430_v19, %v428_v18  ;;  %v558_v22 = vld [vmem:[%s2661_s2 + $0x430] sm:$0xff] (!%p143_p9)  ;;  %v433_v23 = vld [vmem:[%s2661_s2 + $0x48] sm:$0xff] (!%p143_p9)  ;;  %v435_v24 = vld [vmem:[%s2661_s2 + $0x58] sm:$0xff] (!%p143_p9) }
  0x13   : > { %802 = vmatprep.subr.bf16.mxu1 (!%p143_p9), %v667_v16  ;;  %v730_v25 = vpack.c.bf16 (!%p143_p9), %v558_v22, %v556_v20  ;;  %v669_v26 = vpack.c.bf16 (!%p143_p9), %v435_v24, %v433_v23  ;;  %v561_v27 = vld [vmem:[%s2661_s2 + $0x448] sm:$0xff] (!%p143_p9)  ;;  %v563_v28 = vld [vmem:[%s2661_s2 + $0x458] sm:$0xff] (!%p143_p9)  ;;  %v432_v29 = vld [vmem:[%s2661_s2 + $0x40] sm:$0xff] (!%p143_p9) }
  0x14   : > { %968 = vmatprep.subr.bf16.mxu0 (!%p143_p9), %v731_v17  ;;  %v733_v30 = vpack.c.bf16 (!%p143_p9), %v563_v28, %v561_v27  ;;  %v434_v31 = vld [vmem:[%s2661_s2 + $0x50] sm:$0xff] (!%p143_p9)  ;;  %v560_v32 = vld [vmem:[%s2661_s2 + $0x440] sm:$0xff] (!%p143_p9)  ;;  %v437_v35 = vld [vmem:[%s2661_s2 + $0x68] sm:$0xff] (!%p143_p9) }
  0x15   : > { %v562_v33 = vld [vmem:[%s2661_s2 + $0x450] sm:$0xff]  ;;  %803 = vmatpush1.bf16.msra.mxu1 %v666_v21  ;;  %v668_v34 = vpack.c.bf16 %v434_v31, %v432_v29  ;;  %v439_v36 = vld [vmem:[%s2661_s2 + $0x78] sm:$0xff]  ;;  %v565_v37 = vld [vmem:[%s2661_s2 + $0x468] sm:$0xff]  ;;  %s2671_s26 = smov (!%p1845_p10, %s167_s26), 19 }
  0x16   : > { %969 = vmatpush1.bf16.msra.mxu0 %v730_v25  ;;  %804 = vmatprep.subr.bf16.mxu1 %v669_v26  ;;  %v732_v38 = vpack.c.bf16 %v562_v33, %v560_v32  ;;  %v671_v39 = vpack.c.bf16 %v439_v36, %v437_v35  ;;  %v567_v40 = vld [vmem:[%s2661_s2 + $0x478] sm:$0xff]  ;;  %v436_v41 = vld [vmem:[%s2661_s2 + $0x60] sm:$0xff]  ;;  %v438_v42 = vld [vmem:[%s2661_s2 + $0x70] sm:$0xff]  ;;  %s1246_s24 = sshll.u32 %s2671_s26, 6 }
  0x17   : > { %970 = vmatprep.subr.bf16.mxu0 %v733_v30  ;;  %v735_v43 = vpack.c.bf16 %v567_v40, %v565_v37  ;;  %v564_v44 = vld [vmem:[%s2661_s2 + $0x460] sm:$0xff]  ;;  %v566_v45 = vld [vmem:[%s2661_s2 + $0x470] sm:$0xff]  ;;  %v441_v46 = vld [vmem:[%s2661_s2 + $0x88] sm:$0xff]  ;;  %v670_v50 = vpack.c.bf16 %v438_v42, %v436_v41  ;;  %s1909_s29 = scalar_lea.vmem %s2660_s1, %s1246_s24  ;;  %s1249_s24 = smul.u32 2560, %s1464_s16 }
  0x18   : > { %v443_v47 = vld [vmem:[%s2661_s2 + $0x98] sm:$0xff]  ;;  %v569_v48 = vld [vmem:[%s2661_s2 + $0x488] sm:$0xff]  ;;  %v734_v51 = vpack.c.bf16 %v566_v45, %v564_v44  ;;  %v440_v53 = vld [vmem:[%s2661_s2 + $0x80] sm:$0xff] }
  0x19   : > { %v571_v49 = vld [vmem:[%s2661_s2 + $0x498] sm:$0xff]  ;;  %805 = vmatpush1.bf16.msra.mxu1 %v668_v34  ;;  %v673_v52 = vpack.c.bf16 %v443_v47, %v441_v46  ;;  %v442_v54 = vld [vmem:[%s2661_s2 + $0x90] sm:$0xff]  ;;  %v568_v55 = vld [vmem:[%s2661_s2 + $0x480] sm:$0xff]  ;;  %s2607_s30 = scalar_lea.hbm %s2662_s3, %s1249_s24 }
  0x1a   : > { %971 = vmatpush1.bf16.msra.mxu0 %v732_v38  ;;  %806 = vmatprep.subr.bf16.mxu1 %v671_v39  ;;  %v737_v56 = vpack.c.bf16 %v571_v49, %v569_v48  ;;  %v570_v57 = vld [vmem:[%s2661_s2 + $0x490] sm:$0xff]  ;;  %v445_v58 = vld [vmem:[%s2661_s2 + $0xa8] sm:$0xff]  ;;  %v447_v59 = vld [vmem:[%s2661_s2 + $0xb8] sm:$0xff]  ;;  %v672_v62 = vpack.c.bf16 %v442_v54, %v440_v53 }
  0x1b   : > { %972 = vmatprep.subr.bf16.mxu0 %v735_v43  ;;  %v573_v60 = vld [vmem:[%s2661_s2 + $0x4a8] sm:$0xff]  ;;  %v575_v61 = vld [vmem:[%s2661_s2 + $0x4b8] sm:$0xff]  ;;  %v736_v63 = vpack.c.bf16 %v570_v57, %v568_v55  ;;  %v675_v0 = vpack.c.bf16 %v447_v59, %v445_v58  ;;  %v444_v1 = vld [vmem:[%s2661_s2 + $0xa0] sm:$0xff] }
  0x1c   : > { %v446_v2 = vld [vmem:[%s2661_s2 + $0xb0] sm:$0xff]  ;;  %v572_v3 = vld [vmem:[%s2661_s2 + $0x4a0] sm:$0xff]  ;;  %v739_v4 = vpack.c.bf16 %v575_v61, %v573_v60  ;;  %v449_v6 = vld [vmem:[%s2661_s2 + $0xc8] sm:$0xff] }
  0x1d   : > { %807 = vmatpush1.bf16.msra.mxu1 %v670_v50  ;;  %v574_v5 = vld [vmem:[%s2661_s2 + $0x4b0] sm:$0xff]  ;;  %v451_v7 = vld [vmem:[%s2661_s2 + $0xd8] sm:$0xff]  ;;  %v577_v8 = vld [vmem:[%s2661_s2 + $0x4c8] sm:$0xff]  ;;  %v674_v10 = vpack.c.bf16 %v446_v2, %v444_v1 }
  0x1e   : > { %973 = vmatpush1.bf16.msra.mxu0 %v734_v51  ;;  %808 = vmatprep.subr.bf16.mxu1 %v673_v52  ;;  %v579_v9 = vld [vmem:[%s2661_s2 + $0x4d8] sm:$0xff]  ;;  %v738_v11 = vpack.c.bf16 %v574_v5, %v572_v3  ;;  %v677_v12 = vpack.c.bf16 %v451_v7, %v449_v6  ;;  %v448_v13 = vld [vmem:[%s2661_s2 + $0xc0] sm:$0xff]  ;;  %v450_v14 = vld [vmem:[%s2661_s2 + $0xd0] sm:$0xff] }
  0x1f   : > { %974 = vmatprep.subr.bf16.mxu0 %v737_v56  ;;  %v576_v15 = vld [vmem:[%s2661_s2 + $0x4c0] sm:$0xff]  ;;  %v741_v16 = vpack.c.bf16 %v579_v9, %v577_v8  ;;  %v578_v17 = vld [vmem:[%s2661_s2 + $0x4d0] sm:$0xff]  ;;  %v453_v18 = vld [vmem:[%s2661_s2 + $0xe8] sm:$0xff]  ;;  %v676_v22 = vpack.c.bf16 %v450_v14, %v448_v13 }
  0x20   : > { %v455_v19 = vld [vmem:[%s2661_s2 + $0xf8] sm:$0xff]  ;;  %v581_v20 = vld [vmem:[%s2661_s2 + $0x4e8] sm:$0xff]  ;;  %v740_v23 = vpack.c.bf16 %v578_v17, %v576_v15  ;;  %v452_v25 = vld [vmem:[%s2661_s2 + $0xe0] sm:$0xff] }
  0x21   : > { %809 = vmatpush1.bf16.msra.mxu1 %v672_v62  ;;  %v583_v21 = vld [vmem:[%s2661_s2 + $0x4f8] sm:$0xff]  ;;  %v679_v24 = vpack.c.bf16 %v455_v19, %v453_v18  ;;  %v454_v26 = vld [vmem:[%s2661_s2 + $0xf0] sm:$0xff]  ;;  %v580_v27 = vld [vmem:[%s2661_s2 + $0x4e0] sm:$0xff] }
  0x22   : > { %975 = vmatpush1.bf16.msra.mxu0 %v736_v63  ;;  %810 = vmatprep.subr.bf16.mxu1 %v675_v0  ;;  %v743_v28 = vpack.c.bf16 %v583_v21, %v581_v20  ;;  %v582_v29 = vld [vmem:[%s2661_s2 + $0x4f0] sm:$0xff]  ;;  %v457_v30 = vld [vmem:[%s2661_s2 + $0x108] sm:$0xff]  ;;  %v459_v31 = vld [vmem:[%s2661_s2 + $0x118] sm:$0xff]  ;;  %v678_v34 = vpack.c.bf16 %v454_v26, %v452_v25 }
  0x23   : > { %976 = vmatprep.subr.bf16.mxu0 %v739_v4  ;;  %v585_v32 = vld [vmem:[%s2661_s2 + $0x508] sm:$0xff]  ;;  %v587_v33 = vld [vmem:[%s2661_s2 + $0x518] sm:$0xff]  ;;  %v742_v35 = vpack.c.bf16 %v582_v29, %v580_v27  ;;  %v681_v36 = vpack.c.bf16 %v459_v31, %v457_v30  ;;  %v456_v37 = vld [vmem:[%s2661_s2 + $0x100] sm:$0xff] }
  0x24   : > { %v458_v38 = vld [vmem:[%s2661_s2 + $0x110] sm:$0xff]  ;;  %v584_v39 = vld [vmem:[%s2661_s2 + $0x500] sm:$0xff]  ;;  %v745_v40 = vpack.c.bf16 %v587_v33, %v585_v32  ;;  %v461_v42 = vld [vmem:[%s2661_s2 + $0x128] sm:$0xff] }
  0x25   : > { %811 = vmatpush1.bf16.msra.mxu1 %v674_v10  ;;  %v586_v41 = vld [vmem:[%s2661_s2 + $0x510] sm:$0xff]  ;;  %v463_v43 = vld [vmem:[%s2661_s2 + $0x138] sm:$0xff]  ;;  %v589_v44 = vld [vmem:[%s2661_s2 + $0x528] sm:$0xff]  ;;  %v680_v46 = vpack.c.bf16 %v458_v38, %v456_v37 }
  0x26   : > { %977 = vmatpush1.bf16.msra.mxu0 %v738_v11  ;;  %812 = vmatprep.subr.bf16.mxu1 %v677_v12  ;;  %v591_v45 = vld [vmem:[%s2661_s2 + $0x538] sm:$0xff]  ;;  %v744_v47 = vpack.c.bf16 %v586_v41, %v584_v39  ;;  %v683_v48 = vpack.c.bf16 %v463_v43, %v461_v42  ;;  %v460_v49 = vld [vmem:[%s2661_s2 + $0x120] sm:$0xff]  ;;  %v462_v50 = vld [vmem:[%s2661_s2 + $0x130] sm:$0xff] }
  0x27   : > { %978 = vmatprep.subr.bf16.mxu0 %v741_v16  ;;  %v588_v51 = vld [vmem:[%s2661_s2 + $0x520] sm:$0xff]  ;;  %v747_v52 = vpack.c.bf16 %v591_v45, %v589_v44  ;;  %v590_v53 = vld [vmem:[%s2661_s2 + $0x530] sm:$0xff]  ;;  %v465_v54 = vld [vmem:[%s2661_s2 + $0x148] sm:$0xff]  ;;  %v682_v58 = vpack.c.bf16 %v462_v50, %v460_v49 }
  0x28   : > { %v467_v55 = vld [vmem:[%s2661_s2 + $0x158] sm:$0xff]  ;;  %v593_v56 = vld [vmem:[%s2661_s2 + $0x548] sm:$0xff]  ;;  %v746_v59 = vpack.c.bf16 %v590_v53, %v588_v51  ;;  %v464_v61 = vld [vmem:[%s2661_s2 + $0x140] sm:$0xff] }
  0x29   : > { %813 = vmatpush1.bf16.msra.mxu1 %v676_v22  ;;  %v595_v57 = vld [vmem:[%s2661_s2 + $0x558] sm:$0xff]  ;;  %v685_v60 = vpack.c.bf16 %v467_v55, %v465_v54  ;;  %v466_v62 = vld [vmem:[%s2661_s2 + $0x150] sm:$0xff]  ;;  %v592_v63 = vld [vmem:[%s2661_s2 + $0x540] sm:$0xff] }
  0x2a   : > { %979 = vmatpush1.bf16.msra.mxu0 %v740_v23  ;;  %814 = vmatprep.subr.bf16.mxu1 %v679_v24  ;;  %v749_v0 = vpack.c.bf16 %v595_v57, %v593_v56  ;;  %v594_v1 = vld [vmem:[%s2661_s2 + $0x550] sm:$0xff]  ;;  %v469_v2 = vld [vmem:[%s2661_s2 + $0x168] sm:$0xff]  ;;  %v471_v3 = vld [vmem:[%s2661_s2 + $0x178] sm:$0xff]  ;;  %v684_v6 = vpack.c.bf16 %v466_v62, %v464_v61 }
  0x2b   : > { %980 = vmatprep.subr.bf16.mxu0 %v743_v28  ;;  %v597_v4 = vld [vmem:[%s2661_s2 + $0x568] sm:$0xff]  ;;  %v599_v5 = vld [vmem:[%s2661_s2 + $0x578] sm:$0xff]  ;;  %v468_v7 = vld [vmem:[%s2661_s2 + $0x160] sm:$0xff]  ;;  %v748_v8 = vpack.c.bf16 %v594_v1, %v592_v63  ;;  %v687_v9 = vpack.c.bf16 %v471_v3, %v469_v2 }
  0x2c   : > { %v470_v10 = vld [vmem:[%s2661_s2 + $0x170] sm:$0xff]  ;;  %v596_v11 = vld [vmem:[%s2661_s2 + $0x560] sm:$0xff]  ;;  %v751_v13 = vpack.c.bf16 %v599_v5, %v597_v4  ;;  %v473_v14 = vld [vmem:[%s2661_s2 + $0x188] sm:$0xff] }
  0x2d   : > { %815 = vmatpush1.bf16.msra.mxu1 %v678_v34  ;;  %v598_v12 = vld [vmem:[%s2661_s2 + $0x570] sm:$0xff]  ;;  %v475_v15 = vld [vmem:[%s2661_s2 + $0x198] sm:$0xff]  ;;  %v176_v16 = vld [vmem:[%s2659_s0] sm:$0xff]  ;;  %v686_v20 = vpack.c.bf16 %v470_v10, %v468_v7 }
  0x2e   : > { %981 = vmatpush1.bf16.msra.mxu0 %v742_v35  ;;  %816 = vmatprep.subr.bf16.mxu1 %v681_v36  ;;  %v601_v17 = vld [vmem:[%s2661_s2 + $0x588] sm:$0xff]  ;;  %v603_v18 = vld [vmem:[%s2661_s2 + $0x598] sm:$0xff]  ;;  %v1236_v19 = vmul.f32 -1.442695, %v176_v16  ;;  %v750_v21 = vpack.c.bf16 %v598_v12, %v596_v11  ;;  %v689_v22 = vpack.c.bf16 %v475_v15, %v473_v14  ;;  %v472_v23 = vld [vmem:[%s2661_s2 + $0x180] sm:$0xff] }
  0x2f   : > { %982 = vmatprep.subr.bf16.mxu0 %v745_v40  ;;  %v474_v24 = vld [vmem:[%s2661_s2 + $0x190] sm:$0xff]  ;;  %v600_v25 = vld [vmem:[%s2661_s2 + $0x580] sm:$0xff]  ;;  %v753_v26 = vpack.c.bf16 %v603_v18, %v601_v17  ;;  %v477_v28 = vld [vmem:[%s2661_s2 + $0x1a8] sm:$0xff] }
  0x30   : > { %1352 = vpow2.f32 %v1236_v19  ;;  %v602_v27 = vld [vmem:[%s2661_s2 + $0x590] sm:$0xff]  ;;  %v479_v29 = vld [vmem:[%s2661_s2 + $0x1b8] sm:$0xff]  ;;  %v605_v30 = vld [vmem:[%s2661_s2 + $0x5a8] sm:$0xff]  ;;  %v688_v32 = vpack.c.bf16 %v474_v24, %v472_v23 }
  0x31   : > { %817 = vmatpush1.bf16.msra.mxu1 %v680_v46  ;;  %v607_v31 = vld [vmem:[%s2661_s2 + $0x5b8] sm:$0xff]  ;;  %v752_v33 = vpack.c.bf16 %v602_v27, %v600_v25  ;;  %v691_v34 = vpack.c.bf16 %v479_v29, %v477_v28  ;;  %v476_v35 = vld [vmem:[%s2661_s2 + $0x1a0] sm:$0xff]  ;;  %v478_v36 = vld [vmem:[%s2661_s2 + $0x1b0] sm:$0xff] }
  0x32   : > { %983 = vmatpush1.bf16.msra.mxu0 %v744_v47  ;;  %818 = vmatprep.subr.bf16.mxu1 %v683_v48  ;;  %v604_v37 = vld [vmem:[%s2661_s2 + $0x5a0] sm:$0xff]  ;;  %v755_v38 = vpack.c.bf16 %v607_v31, %v605_v30  ;;  %v606_v39 = vld [vmem:[%s2661_s2 + $0x5b0] sm:$0xff]  ;;  %v481_v40 = vld [vmem:[%s2661_s2 + $0x1c8] sm:$0xff]  ;;  %v690_v44 = vpack.c.bf16 %v478_v36, %v476_v35 }
  0x33   : > { %984 = vmatprep.subr.bf16.mxu0 %v747_v52  ;;  %v483_v41 = vld [vmem:[%s2661_s2 + $0x1d8] sm:$0xff]  ;;  %v609_v42 = vld [vmem:[%s2661_s2 + $0x5c8] sm:$0xff]  ;;  %v754_v45 = vpack.c.bf16 %v606_v39, %v604_v37  ;;  %v480_v47 = vld [vmem:[%s2661_s2 + $0x1c0] sm:$0xff] }
  0x34   : > { %v611_v43 = vld [vmem:[%s2661_s2 + $0x5d8] sm:$0xff]  ;;  %v693_v46 = vpack.c.bf16 %v483_v41, %v481_v40  ;;  %v482_v48 = vld [vmem:[%s2661_s2 + $0x1d0] sm:$0xff]  ;;  %v608_v49 = vld [vmem:[%s2661_s2 + $0x5c0] sm:$0xff] }
  0x35   : > { %819 = vmatpush1.bf16.msra.mxu1 %v682_v58  ;;  %v757_v50 = vpack.c.bf16 %v611_v43, %v609_v42  ;;  %v610_v51 = vld [vmem:[%s2661_s2 + $0x5d0] sm:$0xff]  ;;  %v485_v52 = vld [vmem:[%s2661_s2 + $0x1e8] sm:$0xff]  ;;  %v487_v53 = vld [vmem:[%s2661_s2 + $0x1f8] sm:$0xff]  ;;  %v692_v57 = vpack.c.bf16 %v482_v48, %v480_v47 }
  0x36   : > { %985 = vmatpush1.bf16.msra.mxu0 %v746_v59  ;;  %820 = vmatprep.subr.bf16.mxu1 %v685_v60  ;;  %v613_v55 = vld [vmem:[%s2661_s2 + $0x5e8] sm:$0xff]  ;;  %v615_v56 = vld [vmem:[%s2661_s2 + $0x5f8] sm:$0xff]  ;;  %v756_v59 = vpack.c.bf16 %v610_v51, %v608_v49  ;;  %v695_v60 = vpack.c.bf16 %v487_v53, %v485_v52  ;;  %v484_v61 = vld [vmem:[%s2661_s2 + $0x1e0] sm:$0xff] }
  0x37   : > { %986 = vmatprep.subr.bf16.mxu0 %v749_v0  ;;  %v486_v62 = vld [vmem:[%s2661_s2 + $0x1f0] sm:$0xff]  ;;  %v612_v63 = vld [vmem:[%s2661_s2 + $0x5e0] sm:$0xff]  ;;  %v264_v0 = vlaneseq  ;;  %v759_v1 = vpack.c.bf16 %v615_v56, %v613_v55  ;;  %v489_v3 = vld [vmem:[%s2661_s2 + $0x208] sm:$0xff] }
  0x38   : > { %v614_v2 = vld [vmem:[%s2661_s2 + $0x5f0] sm:$0xff]  ;;  %v491_v4 = vld [vmem:[%s2661_s2 + $0x218] sm:$0xff]  ;;  %v617_v5 = vld [vmem:[%s2661_s2 + $0x608] sm:$0xff]  ;;  %v694_v7 = vpack.c.bf16 %v486_v62, %v484_v61 }
  0x39   : > { %821 = vmatpush1.bf16.msra.mxu1 %v684_v6  ;;  %v619_v6 = vld [vmem:[%s2661_s2 + $0x618] sm:$0xff]  ;;  %v697_v10 = vpack.c.bf16 %v491_v4, %v489_v3  ;;  %v184_v16 = vld [vmem:[%s1909_s29 + $0x8] sm:$0xff]  ;;  %v1921_v19 = vld [vmem:[%s2661_s2 + $0x200] sm:$0xff] }
  0x3a   : > { %987 = vmatpush1.bf16.msra.mxu0 %v748_v8  ;;  %822 = vmatprep.subr.bf16.mxu1 %v687_v9  ;;  %v1353_v54 = vpop.eup %1352  ;;  %v758_v8 = vpack.c.bf16 %v614_v2, %v612_v63  ;;  %v1904_v9 = vshrl.u32 %v264_v0, 7  ;;  %v761_v11 = vpack.c.bf16 %v619_v6, %v617_v5  ;;  %v192_v17 = vld [vmem:[%s1909_s29 + $0x48] sm:$0xff]  ;;  %v183_v25 = vld [vmem:[%s1909_s29] sm:$0xff]  ;;  %v495_v36 = vld [vmem:[%s2661_s2 + $0x238] sm:$0xff] }
  0x3b   : > { %988 = vmatprep.subr.bf16.mxu0 %v751_v13  ;;  %v180_v58 = vadd.f32 1.0, %v1353_v54  ;;  %v188_v18 = vld [vmem:[%s1909_s29 + $0x28] sm:$0xff]  ;;  %v187_v30 = vld [vmem:[%s1909_s29 + $0x20] sm:$0xff]  ;;  %v622_v52 = vld [vmem:[%s2661_s2 + $0x630] sm:$0xff] }
  0x3c   : > { %v270_v12 = vsub.s32 1, %v1904_v9  ;;  %v286_v13 = vsub.s32 5, %v1904_v9  ;;  %v266_v14 = vsub.s32 0, %v1904_v9  ;;  %v282_v15 = vsub.s32 4, %v1904_v9  ;;  %v196_v24 = vld [vmem:[%s1909_s29 + $0x68] sm:$0xff]  ;;  %v195_v31 = vld [vmem:[%s1909_s29 + $0x60] sm:$0xff] }
  0x3d   : > { %823 = vmatpush1.bf16.msra.mxu1 %v686_v20  ;;  %1354 = vrcp.f32 %v180_v58  ;;  %v490_v20 = vld [vmem:[%s2661_s2 + $0x210] sm:$0xff]  ;;  %v204_v37 = vld [vmem:[%s1909_s29 + $0xa8] sm:$0xff]  ;;  %v620_v51 = vld [vmem:[%s2661_s2 + $0x620] sm:$0xff] }
  0x3e   : > { %989 = vmatpush1.bf16.msra.mxu0 %v750_v21  ;;  %824 = vmatprep.subr.bf16.mxu1 %v689_v22  ;;  %v616_v21 = vld [vmem:[%s2661_s2 + $0x600] sm:$0xff]  ;;  %v618_v22 = vld [vmem:[%s2661_s2 + $0x610] sm:$0xff]  ;;  %v621_v43 = vld [vmem:[%s2661_s2 + $0x628] sm:$0xff] }
  0x3f   : > { %990 = vmatprep.subr.bf16.mxu0 %v753_v26  ;;  %v191_v26 = vld [vmem:[%s1909_s29 + $0x40] sm:$0xff]  ;;  %v760_v35 = vpack.c.bf16 %v618_v22, %v616_v21  ;;  %v1991_v55 = vld [vmem:[%s2661_s2 + $0x248] sm:$0xff]  ;;  %v499_v0 = vld [vmem:[%s2661_s2 + $0x258] sm:$0xff] }
  0x40   : > { %v203_v58 = vld [vmem:[%s1909_s29 + $0xa0] sm:$0xff]  ;;  %v208_v2 = vld [vmem:[%s1909_s29 + $0xc8] sm:$0xff]  ;;  %v627_v4 = vld [vmem:[%s2661_s2 + $0x658] sm:$0xff]  ;;  %v701_v21 = vpack.c.bf16 %v499_v0, %v1991_v55 }
  0x41   : > { %825 = vmatpush1.bf16.msra.mxu1 %v688_v32  ;;  %v625_v3 = vld [vmem:[%s2661_s2 + $0x648] sm:$0xff]  ;;  %v507_v55 = vld [vmem:[%s2661_s2 + $0x298] sm:$0xff] }
  0x42   : > { %991 = vmatpush1.bf16.msra.mxu0 %v752_v33  ;;  %826 = vmatprep.subr.bf16.mxu1 %v691_v34  ;;  %v493_v33 = vld [vmem:[%s2661_s2 + $0x228] sm:$0xff]  ;;  %v696_v34 = vpack.c.bf16 %v490_v20, %v1921_v19  ;;  %v765_v22 = vpack.c.bf16 %v627_v4, %v625_v3  ;;  %v506_v4 = vld [vmem:[%s2661_s2 + $0x290] sm:$0xff] }
  0x43   : > { %992 = vmatprep.subr.bf16.mxu0 %v755_v38  ;;  %v212_v38 = vld [vmem:[%s1909_s29 + $0xe8] sm:$0xff]  ;;  %v699_v62 = vpack.c.bf16 %v495_v36, %v493_v33  ;;  %v2048_v33 = vld [vmem:[%s2661_s2 + $0x260] sm:$0xff] }
  0x44   : > { %v220_v6 = vld [vmem:[%s1909_s29 + $0x128] sm:$0xff] }
  0x45   : > { %827 = vmatpush1.bf16.msra.mxu1 %v690_v44  ;;  %v623_v44 = vld [vmem:[%s2661_s2 + $0x638] sm:$0xff]  ;;  %v236_v0 = vld [vmem:[%s1909_s29 + $0x1a8] sm:$0xff] }
  0x46   : > { %993 = vmatpush1.bf16.msra.mxu0 %v754_v45  ;;  %828 = vmatprep.subr.bf16.mxu1 %v693_v46  ;;  %v1973_v45 = vld [vmem:[%s2661_s2 + $0x220] sm:$0xff]  ;;  %v763_v63 = vpack.c.bf16 %v623_v44, %v621_v43 }
  0x47   : > { %994 = vmatprep.subr.bf16.mxu0 %v757_v50  ;;  %v1932_v23 = vpop.eup %1354  ;;  %v494_v50 = vld [vmem:[%s2661_s2 + $0x230] sm:$0xff] }
  0x48   : > { %v1938_v27 = vrot.slane %v1932_v23, %v270_v12  ;;  %v1941_v28 = vrot.slane %v1932_v23, %v286_v13  ;;  %v1944_v29 = vrot.slane %v1932_v23, %v266_v14  ;;  %v1949_v32 = vrot.slane %v1932_v23, %v282_v15  ;;  %v228_v12 = vld [vmem:[%s1909_s29 + $0x168] sm:$0xff]  ;;  %v199_v13 = vld [vmem:[%s1909_s29 + $0x80] sm:$0xff] }
  0x49   : > { %829 = vmatpush1.bf16.msra.mxu1 %v692_v57  ;;  %v207_v14 = vld [vmem:[%s1909_s29 + $0xc0] sm:$0xff]  ;;  %v762_v15 = vpack.c.bf16 %v622_v52, %v620_v51  ;;  %v630_v51 = vld [vmem:[%s2661_s2 + $0x670] sm:$0xff]  ;;  %v505_v52 = vld [vmem:[%s2661_s2 + $0x288] sm:$0xff] }
  0x4a   : > { %995 = vmatpush1.bf16.msra.mxu0 %v756_v59  ;;  %830 = vmatprep.subr.bf16.mxu1 %v695_v60  ;;  %v305_v39 = vmul.f32 %v1938_v27, %v184_v16  ;;  %v313_v40 = vmul.f32 %v1938_v27, %v192_v17  ;;  %v309_v41 = vmul.f32 %v1941_v28, %v188_v18  ;;  %v211_v59 = vld [vmem:[%s1909_s29 + $0xe0] sm:$0xff]  ;;  %v498_v16 = vld [vmem:[%s2661_s2 + $0x250] sm:$0xff] }
  0x4b   : > { %996 = vmatprep.subr.bf16.mxu0 %v759_v1  ;;  %v317_v42 = vmul.f32 %v1941_v28, %v196_v24  ;;  %v304_v46 = vmul.f32 %v1944_v29, %v183_v25  ;;  %v312_v47 = vmul.f32 %v1944_v29, %v191_v26  ;;  %v308_v48 = vmul.f32 %v1949_v32, %v187_v30  ;;  %v200_v1 = vld [vmem:[%s1909_s29 + $0x88] sm:$0xff]  ;;  %v624_v17 = vld [vmem:[%s2661_s2 + $0x640] sm:$0xff]  ;;  %v626_v18 = vld [vmem:[%s2661_s2 + $0x650] sm:$0xff] }
  0x4c   : > { %v316_v49 = vmul.f32 %v1949_v32, %v195_v31  ;;  %v385_v53 = vpack.c.bf16 %v313_v40, %v305_v39  ;;  %v325_v56 = vmul.f32 %v1941_v28, %v204_v37  ;;  %v333_v57 = vmul.f32 %v1941_v28, %v212_v38  ;;  %v501_v24 = vld [vmem:[%s2661_s2 + $0x268] sm:$0xff]  ;;  %v503_v25 = vld [vmem:[%s2661_s2 + $0x278] sm:$0xff]  ;;  %v2061_v39 = vld [vmem:[%s2661_s2 + $0x660] sm:$0xff] }
  0x4d   : > { %831 = vmatpush1.bf16.msra.mxu1 %v694_v7  ;;  %v389_v54 = vpack.c.bf16 %v317_v42, %v309_v41  ;;  %v384_v60 = vpack.c.bf16 %v312_v47, %v304_v46  ;;  %v698_v7 = vpack.c.bf16 %v494_v50, %v1973_v45  ;;  %v321_v19 = vmul.f32 %v1938_v27, %v200_v1  ;;  %v629_v26 = vld [vmem:[%s2661_s2 + $0x668] sm:$0xff]  ;;  %v631_v31 = vld [vmem:[%s2661_s2 + $0x678] sm:$0xff]  ;;  %v219_v45 = vld [vmem:[%s1909_s29 + $0x120] sm:$0xff] }
  0x4e   : > { %997 = vmatpush1.bf16.msra.mxu0 %v758_v8  ;;  %883 = vmatprep.subr.bf16.mxu1 %v697_v10  ;;  %v388_v61 = vpack.c.bf16 %v316_v49, %v308_v48  ;;  %v397_v5 = vpack.c.bf16 %v333_v57, %v325_v56  ;;  %v2013_v8 = vld [vmem:[%s2661_s2 + $0x240] sm:$0xff]  ;;  %v324_v10 = vmul.f32 %v1949_v32, %v203_v58  ;;  %v216_v41 = vld [vmem:[%s1909_s29 + $0x108] sm:$0xff]  ;;  %v635_v57 = vld [vmem:[%s2661_s2 + $0x698] sm:$0xff] }
  0x4f   : > { %1049 = vmatprep.subr.bf16.mxu0 %v761_v11  ;;  %832 = vmatprep.mubr.bf16.mxu1 %v385_v53  ;;  %v332_v11 = vmul.f32 %v1949_v32, %v211_v59  ;;  %v329_v20 = vmul.f32 %v1938_v27, %v208_v2  ;;  %v341_v30 = vmul.f32 %v1941_v28, %v220_v6  ;;  %v224_v42 = vld [vmem:[%s1909_s29 + $0x148] sm:$0xff]  ;;  %v227_v46 = vld [vmem:[%s1909_s29 + $0x160] sm:$0xff]  ;;  %v634_v6 = vld [vmem:[%s2661_s2 + $0x690] sm:$0xff] }
  0x50   : > { %998 = vmatprep.mubr.bf16.mxu0 %v389_v54  ;;  %833 = vmatmul.mubr.bf16.vlgmr.msra.gmra.mrb[0].mxu1 %v384_v60  ;;  %v320_v37 = vmul.f32 %v1944_v29, %v199_v13  ;;  %v328_v38 = vmul.f32 %v1944_v29, %v207_v14  ;;  %v700_v43 = vpack.c.bf16 %v498_v16, %v2013_v8  ;;  %v215_v48 = vld [vmem:[%s1909_s29 + $0x100] sm:$0xff]  ;;  %v633_v56 = vld [vmem:[%s2661_s2 + $0x688] sm:$0xff]  ;;  %v511_v13 = vld [vmem:[%s2661_s2 + $0x2b8] sm:$0xff] }
  0x51   : > { %999 = vmatmul.mubr.bf16.vlgmr.msra.gmra.mrb[0].mxu0 %v388_v61  ;;  %884 = vmatpush1.bf16.msra.mxu1 %v696_v34  ;;  %v2053_v34 = vld [vmem:[%s2661_s2 + $0x270] sm:$0xff]  ;;  %v393_v36 = vpack.c.bf16 %v329_v20, %v321_v19  ;;  %v396_v40 = vpack.c.bf16 %v332_v11, %v324_v10  ;;  %v764_v44 = vpack.c.bf16 %v626_v18, %v624_v17  ;;  %v223_v53 = vld [vmem:[%s1909_s29 + $0x140] sm:$0xff]  ;;  %v244_v1 = vld [vmem:[%s1909_s29 + $0x1e8] sm:$0xff] }
  0x52   : > { %1050 = vmatpush1.bf16.msra.mxu0 %v760_v35  ;;  %885 = vmatprep.subr.bf16.mxu1 %v699_v62  ;;  %v349_v35 = vmul.f32 %v1941_v28, %v228_v12  ;;  %v392_v47 = vpack.c.bf16 %v328_v38, %v320_v37  ;;  %v703_v49 = vpack.c.bf16 %v503_v25, %v501_v24  ;;  %v2092_v61 = vld [vmem:[%s2661_s2 + $0x280] sm:$0xff]  ;;  %v509_v12 = vld [vmem:[%s2661_s2 + $0x2a8] sm:$0xff]  ;;  %v639_v16 = vld [vmem:[%s2661_s2 + $0x6b8] sm:$0xff] }
  0x53   : > { %1051 = vmatprep.subr.bf16.mxu0 %v763_v63  ;;  %1008 = vmatprep.mubr.bf16.mxu0 %v397_v5  ;;  %v767_v50 = vpack.c.bf16 %v631_v31, %v629_v26  ;;  %v702_v54 = vpack.c.bf16 %v2053_v34, %v2048_v33  ;;  %v337_v59 = vmul.f32 %v1938_v27, %v216_v41  ;;  %v632_v5 = vld [vmem:[%s2661_s2 + $0x680] sm:$0xff]  ;;  %v232_v14 = vld [vmem:[%s1909_s29 + $0x188] sm:$0xff]  ;;  %v2144_v24 = vld [vmem:[%s2661_s2 + $0x6b0] sm:$0xff] }
  0x54   : > { %v405_v58 = vpack.c.bf16 %v349_v35, %v341_v30  ;;  %842 = vmatprep.mubr.bf16.mxu1 %v393_v36  ;;  %v345_v60 = vmul.f32 %v1938_v27, %v224_v42  ;;  %v340_v62 = vmul.f32 %v1949_v32, %v219_v45  ;;  %v348_v63 = vmul.f32 %v1949_v32, %v227_v46  ;;  %v240_v19 = vld [vmem:[%s1909_s29 + $0x1c8] sm:$0xff]  ;;  %v2129_v20 = vld [vmem:[%s2661_s2 + $0x2a0] sm:$0xff]  ;;  %v515_v41 = vld [vmem:[%s2661_s2 + $0x2d8] sm:$0xff] }
  0x55   : > { %886 = vmatpush1.bf16.msra.mxu1 %v698_v7  ;;  %v336_v2 = vmul.f32 %v1944_v29, %v215_v48  ;;  %v766_v3 = vpack.c.bf16 %v630_v51, %v2061_v39  ;;  %v344_v8 = vmul.f32 %v1944_v29, %v223_v53  ;;  %v705_v10 = vpack.c.bf16 %v507_v55, %v505_v52  ;;  %v235_v26 = vld [vmem:[%s1909_s29 + $0x1a0] sm:$0xff]  ;;  %v2152_v35 = vld [vmem:[%s2661_s2 + $0x2c8] sm:$0xff]  ;;  %v2183_v51 = vld [vmem:[%s2661_s2 + $0x2d0] sm:$0xff] }
  0x56   : > { %1052 = vmatpush1.bf16.msra.mxu0 %v762_v15  ;;  %887 = vmatprep.subr.bf16.mxu1 %v701_v21  ;;  %v401_v7 = vpack.c.bf16 %v345_v60, %v337_v59  ;;  %v769_v11 = vpack.c.bf16 %v635_v57, %v633_v56  ;;  %v637_v15 = vld [vmem:[%s2661_s2 + $0x6a8] sm:$0xff]  ;;  %v357_v17 = vmul.f32 %v1941_v28, %v236_v0  ;;  %v2134_v21 = vld [vmem:[%s2661_s2 + $0x2b0] sm:$0xff]  ;;  %v243_v30 = vld [vmem:[%s1909_s29 + $0x1e0] sm:$0xff] }
  0x57   : > { %1053 = vmatprep.subr.bf16.mxu0 %v765_v22  ;;  %v365_v18 = vmul.f32 %v1941_v28, %v244_v1  ;;  %v2139_v22 = vld [vmem:[%s2661_s2 + $0x6a0] sm:$0xff]  ;;  %v404_v25 = vpack.c.bf16 %v348_v63, %v340_v62  ;;  %v400_v31 = vpack.c.bf16 %v344_v8, %v336_v2  ;;  %v704_v33 = vpack.c.bf16 %v506_v4, %v2092_v61  ;;  %v641_v42 = vld [vmem:[%s2661_s2 + $0x6c8] sm:$0xff]  ;;  %v642_v61 = vld [vmem:[%s2661_s2 + $0x6d0] sm:$0xff] }
  0x58   : > { %843 = vmatmul.mubr.bf16.gmra.mrb[4].mxu1 %v392_v47  ;;  %v768_v34 = vpack.c.bf16 %v634_v6, %v632_v5  ;;  %v353_v36 = vmul.f32 %v1938_v27, %v232_v14  ;;  %v231_v37 = vld [vmem:[%s1909_s29 + $0x180] sm:$0xff]  ;;  %v707_v39 = vpack.c.bf16 %v511_v13, %v509_v12  ;;  %v2173_v47 = vmul.f32 %v1949_v32, %v235_v26  ;;  %v248_v55 = vld [vmem:[%s1909_s29 + $0x208] sm:$0xff]  ;;  %v519_v0 = vld [vmem:[%s2661_s2 + $0x2f8] sm:$0xff] }
  0x59   : > { %1009 = vmatmul.mubr.bf16.gmra.mrb[4].mxu0 %v396_v40  ;;  %888 = vmatpush1.bf16.msra.mxu1 %v700_v43  ;;  %v239_v38 = vld [vmem:[%s1909_s29 + $0x1c0] sm:$0xff]  ;;  %v771_v40 = vpack.c.bf16 %v639_v16, %v637_v15  ;;  %v643_v43 = vld [vmem:[%s2661_s2 + $0x6d8] sm:$0xff]  ;;  %v413_v46 = vpack.c.bf16 %v365_v18, %v357_v17  ;;  %v2176_v48 = vmul.f32 %v1949_v32, %v243_v30  ;;  %v256_v56 = vld [vmem:[%s1909_s29 + $0x248] sm:$0xff]  ;;  %v294_v5 = vsub.s32 7, %v1904_v9 }
  0x5a   : > { %1054 = vmatpush1.bf16.msra.mxu0 %v764_v44  ;;  %889 = vmatprep.subr.bf16.mxu1 %v703_v49  ;;  %v361_v44 = vmul.f32 %v1938_v27, %v240_v19  ;;  %v2170_v45 = vld [vmem:[%s2661_s2 + $0x2c0] sm:$0xff]  ;;  %v252_v49 = vld [vmem:[%s1909_s29 + $0x228] sm:$0xff]  ;;  %v352_v53 = vmul.f32 %v1944_v29, %v231_v37  ;;  %v706_v57 = vpack.c.bf16 %v2134_v21, %v2129_v20  ;;  %v647_v2 = vld [vmem:[%s2661_s2 + $0x6f8] sm:$0xff]  ;;  %v274_v17 = vsub.s32 2, %v1904_v9 }
  0x5b   : > { %1055 = vmatprep.subr.bf16.mxu0 %v767_v50  ;;  %1018 = vmatprep.mubr.bf16.mxu0 %v405_v58  ;;  %v260_v50 = vld [vmem:[%s1909_s29 + $0x268] sm:$0xff]  ;;  %v770_v58 = vpack.c.bf16 %v2144_v24, %v2139_v22  ;;  %v709_v59 = vpack.c.bf16 %v515_v41, %v2152_v35  ;;  %v640_v60 = vld [vmem:[%s2661_s2 + $0x6c0] sm:$0xff]  ;;  %v773_v63 = vpack.c.bf16 %v643_v43, %v641_v42  ;;  %v2248_v13 = vld [vmem:[%s2661_s2 + $0x6f0] sm:$0xff] }
  0x5c   : > { %852 = vmatprep.mubr.bf16.mxu1 %v401_v7  ;;  %v409_v52 = vpack.c.bf16 %v361_v44, %v353_v36  ;;  %v2203_v62 = vld [vmem:[%s2661_s2 + $0x2e8] sm:$0xff]  ;;  %v2218_v4 = vmul.f32 %v1941_v28, %v260_v50  ;;  %v2224_v6 = vld [vmem:[%s2661_s2 + $0x2e0] sm:$0xff]  ;;  %v2229_v7 = vld [vmem:[%s2661_s2 + $0x2f0] sm:$0xff]  ;;  %v2232_v8 = vmul.f32 %v1938_v27, %v248_v55  ;;  %v772_v18 = vpack.c.bf16 %v642_v61, %v640_v60 }
  0x5d   : > { %890 = vmatpush1.bf16.msra.mxu1 %v702_v54  ;;  %v360_v54 = vmul.f32 %v1944_v29, %v239_v38  ;;  %v645_v1 = vld [vmem:[%s2661_s2 + $0x6e8] sm:$0xff]  ;;  %v2243_v12 = vld [vmem:[%s2661_s2 + $0x6e0] sm:$0xff]  ;;  %v711_v19 = vpack.c.bf16 %v519_v0, %v2203_v62  ;;  %v523_v26 = vld [vmem:[%s2661_s2 + $0x318] sm:$0xff] }
  0x5e   : > { %1056 = vmatpush1.bf16.msra.mxu0 %v766_v3  ;;  %891 = vmatprep.subr.bf16.mxu1 %v705_v10  ;;  %v2215_v3 = vmul.f32 %v1941_v28, %v252_v49  ;;  %v2235_v28 = vmul.f32 %v1938_v27, %v256_v56  ;;  %v278_v10 = vsub.s32 3, %v1904_v9  ;;  %v412_v27 = vpack.c.bf16 %v2176_v48, %v2173_v47  ;;  %v251_v14 = vld [vmem:[%s1909_s29 + $0x220] sm:$0xff]  ;;  %v2259_v21 = vld [vmem:[%s2661_s2 + $0x308] sm:$0xff]  ;;  %v190_v38 = vld [vmem:[%s1909_s29 + $0x38] sm:$0xff] }
  0x5f   : > { %1057 = vmatprep.subr.bf16.mxu0 %v769_v11  ;;  %v708_v11 = vpack.c.bf16 %v2183_v51, %v2170_v45  ;;  %v259_v15 = vld [vmem:[%s1909_s29 + $0x260] sm:$0xff]  ;;  %v408_v16 = vpack.c.bf16 %v360_v54, %v352_v53  ;;  %v775_v20 = vpack.c.bf16 %v647_v2, %v645_v1  ;;  %v649_v30 = vld [vmem:[%s2661_s2 + $0x708] sm:$0xff]  ;;  %v2285_v36 = vmul.f32 %v1949_v32, %v251_v14  ;;  %v185_v41 = vld [vmem:[%s1909_s29 + $0x10] sm:$0xff] }
  0x60   : > { %853 = vmatmul.mubr.bf16.gmra.mrb[8].mxu1 %v400_v31  ;;  %v247_v22 = vld [vmem:[%s1909_s29 + $0x200] sm:$0xff]  ;;  %v651_v31 = vld [vmem:[%s2661_s2 + $0x718] sm:$0xff]  ;;  %v2288_v37 = vmul.f32 %v1949_v32, %v259_v15  ;;  %v193_v42 = vld [vmem:[%s1909_s29 + $0x50] sm:$0xff]  ;;  %v2304_v32 = vrot.slane %v1932_v23, %v274_v17  ;;  %v774_v48 = vpack.c.bf16 %v2248_v13, %v2243_v12  ;;  %v713_v49 = vpack.c.bf16 %v523_v26, %v2259_v21 }
  0x61   : > { %1019 = vmatmul.mubr.bf16.gmra.mrb[8].mxu0 %v404_v25  ;;  %892 = vmatpush1.bf16.msra.mxu1 %v704_v33  ;;  %v255_v24 = vld [vmem:[%s1909_s29 + $0x240] sm:$0xff]  ;;  %v710_v25 = vpack.c.bf16 %v2229_v7, %v2224_v6  ;;  %v421_v33 = vpack.c.bf16 %v2218_v4, %v2215_v3  ;;  %v198_v43 = vld [vmem:[%s1909_s29 + $0x78] sm:$0xff]  ;;  %v368_v44 = vmul.f32 %v1944_v29, %v247_v22  ;;  %v522_v51 = vld [vmem:[%s2661_s2 + $0x310] sm:$0xff]  ;;  %v290_v26 = vsub.s32 6, %v1904_v9 }
  0x62   : > { %1058 = vmatpush1.bf16.msra.mxu0 %v768_v34  ;;  %893 = vmatprep.subr.bf16.mxu1 %v707_v39  ;;  %v2277_v34 = vrot.slane %v1932_v23, %v294_v5  ;;  %v2282_v35 = vld [vmem:[%s2661_s2 + $0x300] sm:$0xff]  ;;  %v417_v39 = vpack.c.bf16 %v2235_v28, %v2232_v8  ;;  %v376_v45 = vmul.f32 %v1944_v29, %v255_v24  ;;  %v194_v47 = vld [vmem:[%s1909_s29 + $0x58] sm:$0xff]  ;;  %v525_v53 = vld [vmem:[%s2661_s2 + $0x328] sm:$0xff] }
  0x63   : > { %1059 = vmatprep.subr.bf16.mxu0 %v771_v40  ;;  %1028 = vmatprep.mubr.bf16.mxu0 %v413_v46  ;;  %v2294_v40 = vrot.slane %v1932_v23, %v278_v10  ;;  %v186_v46 = vld [vmem:[%s1909_s29 + $0x18] sm:$0xff]  ;;  %v777_v50 = vpack.c.bf16 %v651_v31, %v649_v30  ;;  %v648_v29 = vld [vmem:[%s2661_s2 + $0x700] sm:$0xff]  ;;  %v2325_v55 = vmul.f32 %v2304_v32, %v185_v41  ;;  %v653_v60 = vld [vmem:[%s2661_s2 + $0x728] sm:$0xff] }
  0x64   : > { %862 = vmatprep.mubr.bf16.mxu1 %v409_v52  ;;  %v650_v52 = vld [vmem:[%s2661_s2 + $0x710] sm:$0xff]  ;;  %v2322_v54 = vmul.f32 %v2277_v34, %v190_v38  ;;  %v2328_v56 = vmul.f32 %v2304_v32, %v193_v42  ;;  %v655_v61 = vld [vmem:[%s2661_s2 + $0x738] sm:$0xff]  ;;  %v319_v62 = vmul.f32 %v2277_v34, %v198_v43  ;;  %v712_v1 = vpack.c.bf16 %v522_v51, %v2282_v35  ;;  %v524_v2 = vld [vmem:[%s2661_s2 + $0x320] sm:$0xff] }
  0x65   : > { %894 = vmatpush1.bf16.msra.mxu1 %v706_v57  ;;  %v201_v57 = vld [vmem:[%s1909_s29 + $0x90] sm:$0xff]  ;;  %v315_v0 = vmul.f32 %v2294_v40, %v194_v47  ;;  %v420_v3 = vpack.c.bf16 %v2288_v37, %v2285_v36  ;;  %v416_v4 = vpack.c.bf16 %v376_v45, %v368_v44  ;;  %v776_v6 = vpack.c.bf16 %v650_v52, %v648_v29  ;;  %v652_v8 = vld [vmem:[%s2661_s2 + $0x720] sm:$0xff]  ;;  %v529_v14 = vld [vmem:[%s2661_s2 + $0x348] sm:$0xff] }
  0x66   : > { %1060 = vmatpush1.bf16.msra.mxu0 %v770_v58  ;;  %895 = vmatprep.subr.bf16.mxu1 %v709_v59  ;;  %v209_v58 = vld [vmem:[%s1909_s29 + $0xd0] sm:$0xff]  ;;  %v527_v59 = vld [vmem:[%s2661_s2 + $0x338] sm:$0xff]  ;;  %v386_v5 = vpack.c.bf16 %v2328_v56, %v2325_v55  ;;  %v2359_v28 = vmul.f32 %v2304_v32, %v201_v57  ;;  %v779_v13 = vpack.c.bf16 %v655_v61, %v653_v60  ;;  %v657_v17 = vld [vmem:[%s2661_s2 + $0x748] sm:$0xff] }
  0x67   : > { %1061 = vmatprep.subr.bf16.mxu0 %v773_v63  ;;  %v307_v63 = vmul.f32 %v2294_v40, %v186_v46  ;;  %v526_v7 = vld [vmem:[%s2661_s2 + $0x330] sm:$0xff]  ;;  %v2362_v10 = vmul.f32 %v2304_v32, %v209_v58  ;;  %v715_v12 = vpack.c.bf16 %v527_v59, %v525_v53  ;;  %v528_v22 = vld [vmem:[%s2661_s2 + $0x340] sm:$0xff]  ;;  %v533_v41 = vld [vmem:[%s2661_s2 + $0x368] sm:$0xff]  ;;  %v2429_v51 = vrot.slane %v1932_v23, %v290_v26 }
  0x68   : > { %863 = vmatmul.mubr.bf16.gmra.mrb[12].mxu1 %v408_v16  ;;  %v225_v15 = vld [vmem:[%s1909_s29 + $0x150] sm:$0xff]  ;;  %v531_v16 = vld [vmem:[%s2661_s2 + $0x358] sm:$0xff]  ;;  %v714_v31 = vpack.c.bf16 %v526_v7, %v524_v2  ;;  %v661_v44 = vld [vmem:[%s2661_s2 + $0x768] sm:$0xff] }
  0x69   : > { %1029 = vmatmul.mubr.bf16.gmra.mrb[12].mxu0 %v412_v27  ;;  %896 = vmatpush1.bf16.msra.mxu1 %v708_v11  ;;  %v217_v11 = vld [vmem:[%s1909_s29 + $0x110] sm:$0xff]  ;;  %v394_v21 = vpack.c.bf16 %v2362_v10, %v2359_v28  ;;  %v2401_v36 = vmul.f32 %v2304_v32, %v225_v15  ;;  %v717_v9 = vpack.c.bf16 %v531_v16, %v529_v14  ;;  %v535_v42 = vld [vmem:[%s2661_s2 + $0x378] sm:$0xff]  ;;  %v660_v57 = vld [vmem:[%s2661_s2 + $0x760] sm:$0xff] }
  0x6a   : > { %1062 = vmatpush1.bf16.msra.mxu0 %v772_v18  ;;  %897 = vmatprep.subr.bf16.mxu1 %v711_v19  ;;  %v654_v27 = vld [vmem:[%s2661_s2 + $0x730] sm:$0xff]  ;;  %v659_v18 = vld [vmem:[%s2661_s2 + $0x758] sm:$0xff]  ;;  %v391_v19 = vpack.c.bf16 %v319_v62, %v2322_v54  ;;  %v2395_v30 = vmul.f32 %v2304_v32, %v217_v11  ;;  %v719_v54 = vpack.c.bf16 %v535_v42, %v533_v41  ;;  %v537_v2 = vld [vmem:[%s2661_s2 + $0x388] sm:$0xff] }
  0x6b   : > { %1063 = vmatprep.subr.bf16.mxu0 %v775_v20  ;;  %1038 = vmatprep.mubr.bf16.mxu0 %v421_v33  ;;  %v387_v20 = vpack.c.bf16 %v315_v0, %v307_v63  ;;  %v530_v24 = vld [vmem:[%s2661_s2 + $0x350] sm:$0xff]  ;;  %v778_v33 = vpack.c.bf16 %v654_v27, %v652_v8  ;;  %v663_v45 = vld [vmem:[%s2661_s2 + $0x778] sm:$0xff]  ;;  %v536_v27 = vld [vmem:[%s2661_s2 + $0x380] sm:$0xff] }
  0x6c   : > { %872 = vmatprep.mubr.bf16.mxu1 %v417_v39  ;;  %v658_v35 = vld [vmem:[%s2661_s2 + $0x750] sm:$0xff]  ;;  %v781_v39 = vpack.c.bf16 %v659_v18, %v657_v17  ;;  %v402_v46 = vpack.c.bf16 %v2401_v36, %v2395_v30  ;;  %v783_v60 = vpack.c.bf16 %v663_v45, %v661_v44  ;;  %v206_v62 = vld [vmem:[%s1909_s29 + $0xb8] sm:$0xff]  ;;  %v541_v15 = vld [vmem:[%s2661_s2 + $0x3a8] sm:$0xff] }
  0x6d   : > { %898 = vmatpush1.bf16.msra.mxu1 %v710_v25  ;;  %v656_v25 = vld [vmem:[%s2661_s2 + $0x740] sm:$0xff]  ;;  %v233_v37 = vld [vmem:[%s1909_s29 + $0x190] sm:$0xff]  ;;  %v214_v63 = vld [vmem:[%s1909_s29 + $0xf8] sm:$0xff]  ;;  %v327_v11 = vmul.f32 %v2277_v34, %v206_v62 }
  0x6e   : > { %1064 = vmatpush1.bf16.msra.mxu0 %v774_v48  ;;  %899 = vmatprep.subr.bf16.mxu1 %v713_v49  ;;  %v241_v38 = vld [vmem:[%s1909_s29 + $0x1d0] sm:$0xff]  ;;  %v716_v48 = vpack.c.bf16 %v530_v24, %v528_v22  ;;  %v532_v49 = vld [vmem:[%s2661_s2 + $0x360] sm:$0xff]  ;;  %v2432_v29 = vmul.f32 %v2304_v32, %v233_v37  ;;  %v780_v53 = vpack.c.bf16 %v658_v35, %v656_v25  ;;  %v543_v16 = vld [vmem:[%s2661_s2 + $0x3b8] sm:$0xff] }
  0x6f   : > { %1065 = vmatprep.subr.bf16.mxu0 %v777_v50  ;;  %v249_v43 = vld [vmem:[%s1909_s29 + $0x210] sm:$0xff]  ;;  %v2435_v52 = vmul.f32 %v2304_v32, %v241_v38  ;;  %v723_v25 = vpack.c.bf16 %v543_v16, %v541_v15  ;;  %v545_v35 = vld [vmem:[%s2661_s2 + $0x3c8] sm:$0xff]  ;;  %v547_v37 = vld [vmem:[%s2661_s2 + $0x3d8] sm:$0xff] }
  0x70   : > { %873 = vmatmul.mubr.bf16.gmra.mrb[16].mxu1 %v416_v4  ;;  %v257_v47 = vld [vmem:[%s1909_s29 + $0x250] sm:$0xff]  ;;  %v2443_v23 = vmul.f32 %v2304_v32, %v249_v43  ;;  %v725_v43 = vpack.c.bf16 %v547_v37, %v545_v35  ;;  %v544_v44 = vld [vmem:[%s2661_s2 + $0x3c0] sm:$0xff]  ;;  %v210_v62 = vld [vmem:[%s1909_s29 + $0xd8] sm:$0xff] }
  0x71   : > { %1039 = vmatmul.mubr.bf16.gmra.mrb[16].mxu0 %v420_v3  ;;  %900 = vmatpush1.bf16.msra.mxu1 %v712_v1  ;;  %v534_v50 = vld [vmem:[%s2661_s2 + $0x370] sm:$0xff]  ;;  %v410_v0 = vpack.c.bf16 %v2435_v52, %v2432_v29  ;;  %v2453_v1 = vmul.f32 %v2304_v32, %v257_v47  ;;  %v539_v3 = vld [vmem:[%s2661_s2 + $0x398] sm:$0xff]  ;;  %v549_v47 = vld [vmem:[%s2661_s2 + $0x3e8] sm:$0xff] }
  0x72   : > { %1066 = vmatpush1.bf16.msra.mxu0 %v776_v6  ;;  %901 = vmatprep.subr.bf16.mxu1 %v715_v12  ;;  %v189_v58 = vld [vmem:[%s1909_s29 + $0x30] sm:$0xff]  ;;  %v718_v4 = vpack.c.bf16 %v534_v50, %v532_v49  ;;  %v335_v12 = vmul.f32 %v2277_v34, %v214_v63  ;;  %v548_v50 = vld [vmem:[%s2661_s2 + $0x3e0] sm:$0xff]  ;;  %v238_v63 = vld [vmem:[%s1909_s29 + $0x1b8] sm:$0xff] }
  0x73   : > { %1067 = vmatprep.subr.bf16.mxu0 %v779_v13  ;;  %1237 = vmatprep.mubr.msk.bf16.mxu0 %vm784_vm0, %v391_v19  ;;  %v197_v59 = vld [vmem:[%s1909_s29 + $0x70] sm:$0xff]  ;;  %v310_v6 = vmul.f32 %v2429_v51, %v189_v58  ;;  %v418_v8 = vpack.c.bf16 %v2453_v1, %v2443_v23  ;;  %v721_v13 = vpack.c.bf16 %v539_v3, %v537_v2  ;;  %v540_v19 = vld [vmem:[%s2661_s2 + $0x3a0] sm:$0xff]  ;;  %v246_v2 = vld [vmem:[%s1909_s29 + $0x1f8] sm:$0xff] }
  0x74   : > { %915 = vmatprep.mubr.bf16.mxu1 %v387_v20  ;;  %v662_v61 = vld [vmem:[%s2661_s2 + $0x770] sm:$0xff]  ;;  %v318_v7 = vmul.f32 %v2429_v51, %v197_v59  ;;  %v399_v20 = vpack.c.bf16 %v335_v12, %v327_v11  ;;  %v359_v11 = vmul.f32 %v2277_v34, %v238_v63  ;;  %v367_v12 = vmul.f32 %v2277_v34, %v246_v2 }
  0x75   : > { %902 = vmatpush1.bf16.msra.mxu1 %v714_v31  ;;  %v782_v32 = vpack.c.bf16 %v662_v61, %v660_v57  ;;  %v538_v14 = vld [vmem:[%s2661_s2 + $0x390] sm:$0xff]  ;;  %v222_v31 = vld [vmem:[%s1909_s29 + $0x138] sm:$0xff] }
  0x76   : > { %1068 = vmatpush1.bf16.msra.mxu0 %v778_v33  ;;  %903 = vmatprep.subr.bf16.mxu1 %v717_v9  ;;  %v390_v17 = vpack.c.bf16 %v318_v7, %v310_v6  ;;  %v720_v18 = vpack.c.bf16 %v538_v14, %v536_v27  ;;  %v205_v22 = vld [vmem:[%s1909_s29 + $0xb0] sm:$0xff]  ;;  %v230_v33 = vld [vmem:[%s1909_s29 + $0x178] sm:$0xff]  ;;  %v343_v41 = vmul.f32 %v2277_v34, %v222_v31 }
  0x77   : > { %1069 = vmatprep.subr.bf16.mxu0 %v781_v39  ;;  %v213_v24 = vld [vmem:[%s1909_s29 + $0xf0] sm:$0xff]  ;;  %v326_v38 = vmul.f32 %v2429_v51, %v205_v22  ;;  %v351_v42 = vmul.f32 %v2277_v34, %v230_v33  ;;  %v415_v14 = vpack.c.bf16 %v367_v12, %v359_v11 }
  0x78   : > { %v542_v26 = vld [vmem:[%s2661_s2 + $0x3b0] sm:$0xff]  ;;  %v334_v9 = vmul.f32 %v2429_v51, %v213_v24 }
  0x79   : > { %904 = vmatpush1.bf16.msra.mxu1 %v716_v48  ;;  %v722_v39 = vpack.c.bf16 %v542_v26, %v540_v19  ;;  %v546_v45 = vld [vmem:[%s2661_s2 + $0x3d0] sm:$0xff]  ;;  %v551_v48 = vld [vmem:[%s2661_s2 + $0x3f8] sm:$0xff]  ;;  %v407_v57 = vpack.c.bf16 %v351_v42, %v343_v41 }
  0x7a   : > { %1070 = vmatpush1.bf16.msra.mxu0 %v780_v53  ;;  %905 = vmatprep.subr.bf16.mxu1 %v719_v54  ;;  %v398_v49 = vpack.c.bf16 %v334_v9, %v326_v38  ;;  %v550_v53 = vld [vmem:[%s2661_s2 + $0x3f0] sm:$0xff]  ;;  %v724_v54 = vpack.c.bf16 %v546_v45, %v544_v44  ;;  %v727_v61 = vpack.c.bf16 %v551_v48, %v549_v47  ;;  %v254_v19 = vld [vmem:[%s1909_s29 + $0x238] sm:$0xff] }
  0x7b   : > { %1071 = vmatprep.subr.bf16.mxu0 %v783_v60  ;;  %v221_v58 = vld [vmem:[%s1909_s29 + $0x130] sm:$0xff]  ;;  %v202_v60 = vld [vmem:[%s1909_s29 + $0x98] sm:$0xff]  ;;  %v726_v3 = vpack.c.bf16 %v550_v53, %v548_v50  ;;  %v375_v31 = vmul.f32 %v2277_v34, %v254_v19 }
  0x7c   : > { %v229_v59 = vld [vmem:[%s1909_s29 + $0x170] sm:$0xff]  ;;  %v323_v7 = vmul.f32 %v2294_v40, %v202_v60  ;;  %v234_v38 = vld [vmem:[%s1909_s29 + $0x198] sm:$0xff] }
  0x7d   : > { %906 = vmatpush1.bf16.msra.mxu1 %v718_v4  ;;  %v342_v4 = vmul.f32 %v2429_v51, %v221_v58  ;;  %v350_v6 = vmul.f32 %v2429_v51, %v229_v59  ;;  %v237_v15 = vld [vmem:[%s1909_s29 + $0x1b0] sm:$0xff]  ;;  %v242_v9 = vld [vmem:[%s1909_s29 + $0x1d8] sm:$0xff] }
  0x7e   : > { %1072 = vmatpush1.bf16.msra.mxu0 %v782_v32  ;;  %907 = vmatprep.subr.bf16.mxu1 %v721_v13  ;;  %v331_v32 = vmul.f32 %v2294_v40, %v210_v62  ;;  %v245_v16 = vld [vmem:[%s1909_s29 + $0x1f0] sm:$0xff]  ;;  %v358_v22 = vmul.f32 %v2429_v51, %v237_v15  ;;  %v363_v42 = vmul.f32 %v2294_v40, %v242_v9  ;;  %v250_v45 = vld [vmem:[%s1909_s29 + $0x218] sm:$0xff] }
  0x7f   : > { %v406_v13 = vpack.c.bf16 %v350_v6, %v342_v4  ;;  %v366_v24 = vmul.f32 %v2429_v51, %v245_v16  ;;  %v253_v35 = vld [vmem:[%s1909_s29 + $0x230] sm:$0xff]  ;;  %v258_v47 = vld [vmem:[%s1909_s29 + $0x258] sm:$0xff]  ;;  %v371_v28 = vmul.f32 %v2294_v40, %v250_v45 }
  0x80   : > { %v395_v27 = vpack.c.bf16 %v331_v32, %v323_v7  ;;  %v261_v37 = vld [vmem:[%s1909_s29 + $0x270] sm:$0xff]  ;;  %v379_v10 = vmul.f32 %v2294_v40, %v258_v47 }
  0x81   : > { %1082 = vmatmul.mubr.bf16.vlgmr.msra.gmra.mrb[0].mxu0 %v390_v17  ;;  %908 = vmatpush1.bf16.msra.mxu1 %v720_v18  ;;  %v218_v17 = vld [vmem:[%s1909_s29 + $0x118] sm:$0xff]  ;;  %v414_v55 = vpack.c.bf16 %v366_v24, %v358_v22  ;;  %v382_v41 = vmul.f32 %v2429_v51, %v261_v37 }
  0x82   : > { %1238 = vmatprep.mubr.msk.bf16.mxu0 %vm784_vm0, %v399_v20  ;;  %909 = vmatprep.subr.bf16.mxu1 %v723_v25  ;;  %v226_v18 = vld [vmem:[%s1909_s29 + $0x158] sm:$0xff]  ;;  %v339_v25 = vmul.f32 %v2294_v40, %v218_v17 }
  0x83   : > { %v262_v20 = vld [vmem:[%s1909_s29 + $0x278] sm:$0xff]  ;;  %v347_v26 = vmul.f32 %v2294_v40, %v226_v18  ;;  %s164_s29 = sand.u32 1, %s1410_s13  }
  0x84   : > { %v383_v33 = vmul.f32 %v2277_v34, %v262_v20  ;;  %v355_v34 = vmul.f32 %v2294_v40, %v234_v38  ;;  %s1310_s19 = smul.u32 160, %s164_s29  ;;  %s2618_s16 = scalar_lea.sflag [#allocation3], %s164_s29 }
  0x85   : > { %910 = vmatpush1.bf16.msra.mxu1 %v722_v39  ;;  %v403_v56 = vpack.c.bf16 %v347_v26, %v339_v25  ;;  %v374_v39 = vmul.f32 %v2429_v51, %v253_v35 }
  0x86   : > { %911 = vmatprep.subr.bf16.mxu1 %v725_v43  ;;  %v411_v44 = vpack.c.bf16 %v363_v42, %v355_v34  ;;  %s2575_s20 = scalar_lea.vmem [#allocation2], %s1310_s19 }
  0x87   : > { %v422_v43 = vpack.c.bf16 %v382_v41, %v374_v39  ;;  %s1168_s27 = sshll.u32 %s2575_s20, 4  ;;  %s2609_s27 = int_to_ptr.vmem [resolvable:$true] %s1168_s27 }
  0x88   : > { %s1356_s4 = scalar_lea.vmem %s2609_s27, 2560  ;;  %p1363_p0 = scmp.lt.s32.totalorder %s2609_s27, %s1361_s25 }
  0x89   : > { %1092 = vmatmul.mubr.bf16.gmra.mrb[4].mxu0 %v398_v49  ;;  %912 = vmatpush1.bf16.msra.mxu1 %v724_v54  ;;  %p1357_p11 = scmp.ne.s32.totalorder %s2609_s27, %s1356_s4  ;;  %p1364_p1 = scmp.lt.s32.totalorder %s1362_s6, %s1356_s4 }
  0x8a   : > { %1239 = vmatprep.mubr.msk.bf16.mxu0 %vm784_vm0, %v407_v57  ;;  %913 = vmatprep.subr.bf16.mxu1 %v727_v61 }
  0x8b   : > { %p1358_p12 = pnand %p1357_p11, %p1481_p5  ;;  %p1365_p2 = por %p1364_p1, %p1363_p0 }
  0x8d   : > { %914 = vmatpush1.bf16.msra.mxu1 %v726_v3  ;;  %p1359_p13 = pneg %p1358_p12 }
  0x8f   : > { %p1366_p3 = pnand %p1365_p2, %p1359_p13 }
  0x90   : > { %916 = vmatmul.mubr.bf16.vlgmr.msra.gmra.mrb[0].mxu1 %v386_v5  ;;  %v423_v5 = vpack.c.bf16 %v383_v33, %v375_v31 }
  0x91   : > { %1102 = vmatmul.mubr.bf16.gmra.mrb[8].mxu0 %v406_v13  ;;  %925 = vmatprep.mubr.bf16.mxu1 %v395_v27 }
  0x92   : > { %1240 = vmatprep.mubr.msk.bf16.mxu0 %vm784_vm0, %v415_v14 }
  0x98   : > { %926 = vmatmul.mubr.bf16.gmra.mrb[4].mxu1 %v394_v21  ;;  %v419_v21 = vpack.c.bf16 %v379_v10, %v371_v28 }
  0x99   : > { %1112 = vmatmul.mubr.bf16.gmra.mrb[12].mxu0 %v414_v55  ;;  %935 = vmatprep.mubr.bf16.mxu1 %v403_v56 }
  0x9a   : > { %1241 = vmatprep.mubr.msk.bf16.mxu0 %vm784_vm0, %v423_v5 }
  0xa0   : > { %936 = vmatmul.mubr.bf16.gmra.mrb[8].mxu1 %v402_v46 }
  0xa1   : > { %1122 = vmatmul.mubr.bf16.gmra.mrb[16].mxu0 %v422_v43  ;;  %945 = vmatprep.mubr.bf16.mxu1 %v411_v44 }
  0xa8   : > { %946 = vmatmul.mubr.bf16.gmra.mrb[12].mxu1 %v410_v0 }
  0xa9   : > { %955 = vmatprep.mubr.bf16.mxu1 %v419_v21 }
  0xb0   : > { %956 = vmatmul.mubr.bf16.gmra.mrb[16].mxu1 %v418_v8 }
 0x154   : > { %v1083_v30 = vpop.f32.mrb[0].mxu0 }
 0x155   : > { %v1085_v36 = vpop.f32.mrb[1].mxu0 }
 0x156   : > { %v1087_v46 = vpop.f32.mrb[2].mxu0 }
 0x157   : > { %v1089_v51 = vpop.f32.mrb[3].mxu0 }
 0x15c   : > { %v1093_v48 = vpop.f32.mrb[4].mxu0 }
 0x15d   : > { %v1095_v49 = vpop.f32.mrb[5].mxu0 }
 0x15e   : > { %v1097_v50 = vpop.f32.mrb[6].mxu0 }
 0x15f   : > { %v1099_v53 = vpop.f32.mrb[7].mxu0 }
 0x163   : > { %v917_v40 = vpop.f32.mrb[0].mxu1 }
 0x164   : > { %v1103_v54 = vpop.f32.mrb[8].mxu0  ;;  %v1250_v29 = vadd.f32 %v1083_v30, %v917_v40  ;;  %v919_v52 = vpop.f32.mrb[1].mxu1 }
 0x165   : > { %v1105_v0 = vpop.f32.mrb[9].mxu0  ;;  %v1251_v57 = vadd.f32 %v1085_v36, %v919_v52  ;;  %v921_v23 = vpop.f32.mrb[2].mxu1 }
 0x166   : > { %v1107_v1 = vpop.f32.mrb[10].mxu0  ;;  %1132 = vst [vmem:[%s2575_s20] sm:$0xff] %v1250_v29  ;;  %v1252_v8 = vadd.f32 %v1087_v46, %v921_v23  ;;  %v923_v58 = vpop.f32.mrb[3].mxu1 }
 0x167   : > { %v1109_v59 = vpop.f32.mrb[11].mxu0  ;;  %1134 = vst.msk [vmem:[%s2575_s20 + $0x8] sm:$0xff] %vm1133_vm1, %v1251_v57  ;;  %v1253_v60 = vadd.f32 %v1089_v51, %v923_v58 }
 0x168   : > { %1135 = vst [vmem:[%s2575_s20 + $0x10] sm:$0xff] %v1252_v8 }
 0x169   : > { %1136 = vst.msk [vmem:[%s2575_s20 + $0x18] sm:$0xff] %vm1133_vm1, %v1253_v60 }
 0x16b   : > { %v927_v61 = vpop.f32.mrb[4].mxu1 }
 0x16c   : > { %v1113_v62 = vpop.f32.mrb[12].mxu0  ;;  %v1254_v63 = vadd.f32 %v1093_v48, %v927_v61  ;;  %v929_v2 = vpop.f32.mrb[5].mxu1 }
 0x16d   : > { %v1115_v3 = vpop.f32.mrb[13].mxu0  ;;  %v1255_v4 = vadd.f32 %v1095_v49, %v929_v2  ;;  %v931_v6 = vpop.f32.mrb[6].mxu1 }
 0x16e   : > { %v1117_v7 = vpop.f32.mrb[14].mxu0  ;;  %1137 = vst [vmem:[%s2575_s20 + $0x20] sm:$0xff] %v1254_v63  ;;  %v1256_v32 = vadd.f32 %v1097_v50, %v931_v6  ;;  %v933_v11 = vpop.f32.mrb[7].mxu1 }
 0x16f   : > { %v1119_v12 = vpop.f32.mrb[15].mxu0  ;;  %1138 = vst.msk [vmem:[%s2575_s20 + $0x28] sm:$0xff] %vm1133_vm1, %v1255_v4  ;;  %v1257_v13 = vadd.f32 %v1099_v53, %v933_v11 }
 0x170   : > { %1139 = vst [vmem:[%s2575_s20 + $0x30] sm:$0xff] %v1256_v32 }
 0x171   : > { %1140 = vst.msk [vmem:[%s2575_s20 + $0x38] sm:$0xff] %vm1133_vm1, %v1257_v13 }
 0x173   : > { %v937_v27 = vpop.f32.mrb[8].mxu1 }
 0x174   : > { %v1123_v14 = vpop.f32.mrb[16].mxu0  ;;  %v1258_v15 = vadd.f32 %v1103_v54, %v937_v27  ;;  %v939_v16 = vpop.f32.mrb[9].mxu1 }
 0x175   : > { %v1125_v17 = vpop.f32.mrb[17].mxu0  ;;  %v1259_v18 = vadd.f32 %v1105_v0, %v939_v16  ;;  %v941_v19 = vpop.f32.mrb[10].mxu1 }
 0x176   : > { %v1127_v20 = vpop.f32.mrb[18].mxu0  ;;  %1141 = vst [vmem:[%s2575_s20 + $0x40] sm:$0xff] %v1258_v15  ;;  %v1260_v22 = vadd.f32 %v1107_v1, %v941_v19  ;;  %v943_v24 = vpop.f32.mrb[11].mxu1 }
 0x177   : > { %v1129_v25 = vpop.f32.mrb[19].mxu0  ;;  %1142 = vst.msk [vmem:[%s2575_s20 + $0x48] sm:$0xff] %vm1133_vm1, %v1259_v18  ;;  %v1261_v26 = vadd.f32 %v1109_v59, %v943_v24 }
 0x178   : > { %1143 = vst [vmem:[%s2575_s20 + $0x50] sm:$0xff] %v1260_v22 }
 0x179   : > { %1144 = vst.msk [vmem:[%s2575_s20 + $0x58] sm:$0xff] %vm1133_vm1, %v1261_v26 }
 0x17b   : > { %v947_v31 = vpop.f32.mrb[12].mxu1 }
 0x17c   : > { %v1262_v33 = vadd.f32 %v1113_v62, %v947_v31  ;;  %v949_v55 = vpop.f32.mrb[13].mxu1 }
 0x17d   : > { %v1263_v56 = vadd.f32 %v1115_v3, %v949_v55  ;;  %v951_v5 = vpop.f32.mrb[14].mxu1 }
 0x17e   : > { %1145 = vst [vmem:[%s2575_s20 + $0x60] sm:$0xff] %v1262_v33  ;;  %v1264_v35 = vadd.f32 %v1117_v7, %v951_v5  ;;  %v953_v37 = vpop.f32.mrb[15].mxu1 }
 0x17f   : > { %1146 = vst.msk [vmem:[%s2575_s20 + $0x68] sm:$0xff] %vm1133_vm1, %v1263_v56  ;;  %v1265_v38 = vadd.f32 %v1119_v12, %v953_v37 }
 0x180   : > { %1147 = vst [vmem:[%s2575_s20 + $0x70] sm:$0xff] %v1264_v35 }
 0x181   : > { %1148 = vst.msk [vmem:[%s2575_s20 + $0x78] sm:$0xff] %vm1133_vm1, %v1265_v38 }
 0x183   : > { %v957_v9 = vpop.f32.mrb[16].mxu1 }
 0x184   : > { %v1266_v39 = vadd.f32 %v1123_v14, %v957_v9  ;;  %v959_v41 = vpop.f32.mrb[17].mxu1 }
 0x185   : > { %v1267_v34 = vadd.f32 %v1125_v17, %v959_v41  ;;  %v961_v42 = vpop.f32.mrb[18].mxu1 }
 0x186   : > { %1149 = vst [vmem:[%s2575_s20 + $0x80] sm:$0xff] %v1266_v39  ;;  %v1268_v43 = vadd.f32 %v1127_v20, %v961_v42  ;;  %v963_v44 = vpop.f32.mrb[19].mxu1 }
 0x187   : > { %1150 = vst.msk [vmem:[%s2575_s20 + $0x88] sm:$0xff] %vm1133_vm1, %v1267_v34  ;;  %v1269_v45 = vadd.f32 %v1129_v25, %v963_v44 }
 0x188   : > { %1151 = vst [vmem:[%s2575_s20 + $0x90] sm:$0xff] %v1268_v43 }
 0x189   : > { %1152 = vst.msk [vmem:[%s2575_s20 + $0x98] sm:$0xff] %vm1133_vm1, %v1269_v45 }
 0x18a   : > { %1369 = shalt.err (!%p1366_p3)
}
 0x18b   : > { %s1370_s7 = scalar_lea.hbm %s2607_s30, 2560  ;;  %s1374_s10 = scalar_lea.hbm %s2662_s3, 5120 }
 0x18c   : > { %p1371_p4 = scmp.ne.s32.totalorder %s2607_s30, %s1370_s7  ;;  %p1375_p9 = scmp.lt.u32.totalorder %s2607_s30, %s2662_s3 }
 0x18d   : > { %p1376_p10 = scmp.lt.u32.totalorder %s1374_s10, %s1370_s7  ;;  %p1378_p12 = scmp.lt.u32.totalorder %s1370_s7, %s2607_s30 }
 0x18e   : > { %p1372_p7 = pnand %p1371_p4, %p1481_p5 }
 0x18f   : > { %p1377_p11 = por %p1376_p10, %p1375_p9 }
 0x190   : > { %p1373_p8 = pneg %p1372_p7 }
 0x191   : > { %p1379_p13 = por %p1378_p12, %p1377_p11 }
 0x193   : > { %p1380_p0 = pnand %p1379_p13, %p1373_p8 }
 0x195   : > { %1383 = shalt.err (!%p1380_p0)
}
 0x196   : > { %s1421_s29 = smov 256   ;;  %s1422_s19 = smov 16  }
 0x197   : > { %1311 = dma.vmem_to_hbm [thread:$0]  (%p1481_p5), %s2609_s27, 2560, %s2607_s30, %s2618_s16, %s1421_s29, %s1421_s29, %s1422_s19  }
 0x198 PF: > { %p1317_p1 = scmp.ge.s32.totalorder %s1418_s15, 2  ;;  %s1183_s20 = sand.u32 1, %s1406_s12  }
 0x199   : > { %s1184_s24 = scalar_lea.sflag [#allocation3], %s1183_s20 }
 0x19a   : > { %p1314_p2 = pnand %p1317_p1, %p1485_p6 }
 0x19c   : > { %1401 = dma.done.wait (!%p1314_p2), %s1184_s24, 2560  }
 0x19d   : > { %1403 = vsyncadd (!%p1314_p2), %s1184_s24, 4294964736  ;;  %p13_p3 = scmp.ge.s32.totalorder %s1468_s18, 4   ;;  %s2666_s12 = smov %s1410_s13 }
 0x19e   : > { %s2667_s13 = smov %s1414_s14  ;;  %s2668_s14 = smov %s1479_s21 }
 0x19f   : > { %s2669_s15 = smov %s1468_s18  ;;  %15 = sbr.rel (!%p13_p3) target bundleno = 3 (0x3), region = 67 }
 0x1a6   :  { %1189 = vsyncpa [#allocation3], 1 }
 0x1a7   :  { %1191 = vsyncpa [#allocation3 + $0x1], 1 }

</bundles_post_ra>
